<compile_context>
chip_gen: v7x
topology: tpu7x:2x2x1
jax: 0.10.0
libtpu: 0.0.40
codegen_flags: <defaults>
</compile_context>

<pallas_src>
import math

import jax
import jax.numpy as jnp
from jax.experimental import pallas as pl
from jax.experimental.pallas import tpu as pltpu

NUM_CLASSES = 256
LOG_SCALE_MIN = -16.0  # value used by DiscretizedMixturelogisticLoss.forward


def _round_up(x, m):
    return (x + m - 1) // m * m


def _pick_layout(T, nr_mix, batch):
    """Factor (padded) T as NR rows x L lanes and pick a row block R | NR.

    Rows map to sublanes (want multiples of 8 -> fully packed vregs), lanes
    map to the 128-wide lane axis.  Padding is only introduced when T does not
    factor nicely.
    """
    T128 = _round_up(max(T, 1), 128)
    TEMP_BYTES = 512 * 1024  # budget per f32 (M, R, L) temporary per grid step

    best = None
    # Pass 1: rows a multiple of 8 with no padding beyond 128-alignment.
    for L in (512, 384, 256, 128):
        if L <= T128 and T128 % L == 0 and (T128 // L) % 8 == 0:
            best = (T128, L, T128 // L, 8)
            break
    # Pass 2: small / awkward T -> one full-extent row block (no extra pad).
    if best is None:
        nr = T128 // 128
        if nr <= 64 and nr * 128 * nr_mix * 4 <= TEMP_BYTES:
            best = (T128, 128, nr, nr)
    # Pass 3: pad T up to a multiple of 8*128 and tile rows in groups of 8.
    if best is None:
        Tp = _round_up(T128, 8 * 128)
        best = (Tp, 128, Tp // 128, 8)

    T_pad, L, NR, R = best
    # Grow the row block (bigger DMAs, fewer grid steps — single-TC v5e/v6e
    # benefit) while per-temp VMEM stays modest; keep >=2 grid steps when B==1
    # so v7x megacore still has parallel work.
    while (R < NR and NR % (2 * R) == 0
           and 2 * R * L * nr_mix * 4 <= TEMP_BYTES
           and (batch >= 2 or NR // (2 * R) >= 2)):
        R *= 2
    return T_pad, L, NR, R


def _dmol_kernel(y_ref, yh_ref, out_ref):
    """Per-tile negative log-likelihood of the discretized logistic mixture.

    Shapes inside the kernel:
      y_ref   : (R, L)            target samples for this (batch, time) tile
      yh_ref  : (3, M, R, L)      [logits, means, log_scales] slabs
      out_ref : (R, L)            per-sample loss
    All elementwise work runs on fully packed (R, L) vregs; the mixture dim M
    is a leading dim, so the two LSE reductions are plain VPU max/add chains.
    """
    y = y_ref[...].astype(jnp.float32)[None]                  # (1, R, L)
    logit = yh_ref[0].astype(jnp.float32)                     # (M, R, L)
    means = yh_ref[1].astype(jnp.float32)                     # (M, R, L)
    log_scales = jnp.maximum(yh_ref[2].astype(jnp.float32), LOG_SCALE_MIN)

    inv_stdv = jnp.exp(-log_scales)
    centered = y - means
    half_bin = 1.0 / (NUM_CLASSES - 1)
    plus_in = inv_stdv * (centered + half_bin)
    min_in = inv_stdv * (centered - half_bin)
    mid_in = inv_stdv * centered

    # Shared e = exp(-|x|) between each sigmoid / softplus pair.
    # log(1 + e) with e in (0, 1] is numerically equivalent to log1p here
    # (absolute error < 1 ulp of the surrounding terms) and lowers cleanly.
    e_p = jnp.exp(-jnp.abs(plus_in))
    e_m = jnp.exp(-jnp.abs(min_in))
    e_d = jnp.exp(-jnp.abs(mid_in))
    l1p_p = jnp.log(1.0 + e_p)
    l1p_m = jnp.log(1.0 + e_m)
    l1p_d = jnp.log(1.0 + e_d)

    # log(sigmoid(x)) = min(x, 0) - log(1+e);  -softplus(x) = -max(x,0) - log(1+e)
    log_cdf_plus = jnp.minimum(plus_in, 0.0) - l1p_p
    log_one_minus_cdf_min = -jnp.maximum(min_in, 0.0) - l1p_m
    log_pdf_mid = mid_in - log_scales - 2.0 * (jnp.maximum(mid_in, 0.0) + l1p_d)

    def _sigmoid_from_e(x, e):
        # sigmoid(x) = where(x>=0, 1/(1+e), e/(1+e)) with e = exp(-|x|)
        d = 1.0 + e
        r = pl.reciprocal(d, approx=True)
        r = r * (2.0 - d * r)              # one Newton step -> ~f32 accurate
        return jnp.where(x >= 0.0, r, e * r)

    cdf_delta = _sigmoid_from_e(plus_in, e_p) - _sigmoid_from_e(min_in, e_m)

    inner_inner = jnp.where(
        cdf_delta > 1e-5,
        jnp.log(jnp.maximum(cdf_delta, 1e-12)),
        log_pdf_mid - math.log((NUM_CLASSES - 1) / 2.0),
    )
    inner = jnp.where(y > 0.999, log_one_minus_cdf_min, inner_inner)
    log_probs = jnp.where(y < -0.999, log_cdf_plus, inner)

    # Fused double LSE over the mixture (leading) dim:
    #   loss = -LSE_M(log_probs + log_softmax(logits))
    #        = LSE_M(logits) - LSE_M(log_probs + logits)
    s = log_probs + logit
    m_s = jnp.max(s, axis=0, keepdims=True)
    lse_s = m_s[0] + jnp.log(jnp.sum(jnp.exp(s - m_s), axis=0))
    m_l = jnp.max(logit, axis=0, keepdims=True)
    lse_l = m_l[0] + jnp.log(jnp.sum(jnp.exp(logit - m_l), axis=0))

    out_ref[...] = lse_l - lse_s                               # (R, L)


def discretized_mix_logistic_losses(y_hat, y):
    """Per-step losses with shape (B, T, 1) (reduce=False semantics)."""
    B, C, T = y_hat.shape
    assert C % 3 == 0
    nr_mix = C // 3

    T_pad, L, NR, R = _pick_layout(T, nr_mix, B)

    y2 = y.reshape(B, T)                 # keep native dtype; kernel casts to f32
    if T_pad != T:
        y_hat = jnp.pad(y_hat, [(0, 0), (0, 0), (0, T_pad - T)])
        y2 = jnp.pad(y2, [(0, 0), (0, T_pad - T)])

    # Free (metadata-only) reshapes: split the channel dim into (3, nr_mix) and
    # the time dim into (rows, lanes).  No slicing / transposing copies.
    yh5 = y_hat.reshape(B, 3, nr_mix, NR, L)
    y3 = y2.reshape(B, NR, L)

    grid = (B, NR // R)

    elems = B * nr_mix * T_pad
    in_bytes = (yh5.size * jnp.dtype(yh5.dtype).itemsize
                + y3.size * jnp.dtype(y3.dtype).itemsize)
    cost = pl.CostEstimate(
        flops=int(50 * elems),
        transcendentals=int(12 * elems),
        bytes_accessed=int(in_bytes + B * T_pad * 4),
    )

    out = pl.pallas_call(
        _dmol_kernel,
        out_shape=jax.ShapeDtypeStruct((B, NR, L), jnp.float32),
        grid_spec=pltpu.PrefetchScalarGridSpec(
            num_scalar_prefetch=0,
            grid=grid,
            in_specs=[
                pl.BlockSpec((None, R, L), lambda b, r: (b, r, 0)),
                pl.BlockSpec((None, 3, nr_mix, R, L),
                             lambda b, r: (b, 0, 0, r, 0)),
            ],
            out_specs=pl.BlockSpec((None, R, L), lambda b, r: (b, r, 0)),
        ),
        compiler_params=pltpu.CompilerParams(
            dimension_semantics=("parallel", "parallel"),
            vmem_limit_bytes=32 * 1024 * 1024,
        ),
        cost_estimate=cost,
    )(y3, yh5)

    losses = out.reshape(B, T_pad)[:, :T]
    return losses.reshape(B, T, 1)


def discretized_mixture_logistic_loss_forward(input, target):
    """Equivalent of DiscretizedMixturelogisticLoss.forward(input, target)."""
    losses = discretized_mix_logistic_losses(input, target)
    assert losses.shape == target.shape
    return jnp.mean(losses)


# ---------------- pure-JAX reference (mirrors the PyTorch code) -------------
def _reference_loss(y_hat, y):
    B, C, T = y_hat.shape
    nr_mix = C // 3
    yh = jnp.transpose(y_hat, (0, 2, 1)).astype(jnp.float32)   # (B, T, C)
    logit_probs = yh[:, :, :nr_mix]
    means = yh[:, :, nr_mix:2 * nr_mix]
    log_scales = jnp.maximum(yh[:, :, 2 * nr_mix:3 * nr_mix], LOG_SCALE_MIN)
    yb = jnp.broadcast_to(y.astype(jnp.float32), means.shape)
    centered_y = yb - means
    inv_stdv = jnp.exp(-log_scales)
    plus_in = inv_stdv * (centered_y + 1.0 / (NUM_CLASSES - 1))
    min_in = inv_stdv * (centered_y - 1.0 / (NUM_CLASSES - 1))
    cdf_plus = jax.nn.sigmoid(plus_in)
    cdf_min = jax.nn.sigmoid(min_in)
    log_cdf_plus = plus_in - jax.nn.softplus(plus_in)
    log_one_minus_cdf_min = -jax.nn.softplus(min_in)
    cdf_delta = cdf_plus - cdf_min
    mid_in = inv_stdv * centered_y
    log_pdf_mid = mid_in - log_scales - 2.0 * jax.nn.softplus(mid_in)
    inner_inner = jnp.where(cdf_delta > 1e-5,
                            jnp.log(jnp.maximum(cdf_delta, 1e-12)),
                            log_pdf_mid - math.log((NUM_CLASSES - 1) / 2.0))
    inner = jnp.where(yb > 0.999, log_one_minus_cdf_min, inner_inner)
    log_probs = jnp.where(yb < -0.999, log_cdf_plus, inner)
    log_probs = log_probs + jax.nn.log_softmax(logit_probs, axis=-1)
    losses = -jax.scipy.special.logsumexp(log_probs, axis=-1)[..., None]
    return jnp.mean(losses)


if __name__ == "__main__":
    # Small shapes consistent with the module: y_hat (B, 3*nr_mix, T), y (B, T, 1).
    B, nr_mix, T = 2, 4, 1024
    C = 3 * nr_mix

    key = jax.random.PRNGKey(0)
    k1, k2 = jax.random.split(key)
    y_hat = jax.random.normal(k1, (B, C, T), dtype=jnp.float32)
    target = jax.random.uniform(k2, (B, T, 1), dtype=jnp.float32,
                                minval=-1.0, maxval=1.0)

    loss = discretized_mixture_logistic_loss_forward(y_hat, target)
    loss = jax.block_until_ready(loss)

    ref = _reference_loss(y_hat, target)
    assert jnp.allclose(loss, ref, rtol=2e-4, atol=2e-5), (loss, ref)

    print("KERNEL_OK")
</pallas_src>

<mosaic_0001>
module attributes {stable_mosaic.version = 11 : i64} {
  func.func @_dmol_kernel(%arg0: i32, %arg1: i32, %arg2: memref<1x8x128xf32, #tpu.memory_space<vmem>>, %arg3: memref<1x3x4x8x128xf32, #tpu.memory_space<vmem>>, %arg4: memref<1x8x128xf32, #tpu.memory_space<vmem>>) attributes {dimension_semantics = [#tpu.dimension_semantics<parallel>, #tpu.dimension_semantics<parallel>], iteration_bounds = array<i64: 2, 1>, scalar_prefetch = 0 : i64, scratch_operands = 0 : i64, tpu.core_type = #tpu.core_type<tc>, window_params = [{transform_indices = @transform_0, window_bounds = array<i64: 1, 8, 128>}, {transform_indices = @transform_1, window_bounds = array<i64: 1, 3, 4, 8, 128>}, {transform_indices = @transform_2, window_bounds = array<i64: 1, 8, 128>}]} {
    %c0 = arith.constant 0 : index
    %c0_0 = arith.constant 0 : index
    %c0_1 = arith.constant 0 : index
    %0 = vector.load %arg2[%c0, %c0_0, %c0_1] : memref<1x8x128xf32, #tpu.memory_space<vmem>>, vector<1x8x128xf32>
    %1 = vector.shape_cast %0 : vector<1x8x128xf32> to vector<8x128xf32>
    %2 = vector.shape_cast %1 : vector<8x128xf32> to vector<1x8x128xf32>
    %c0_2 = arith.constant 0 : index
    %c0_3 = arith.constant 0 : index
    %c0_4 = arith.constant 0 : index
    %c0_5 = arith.constant 0 : index
    %c0_6 = arith.constant 0 : index
    %3 = vector.load %arg3[%c0_2, %c0_3, %c0_4, %c0_5, %c0_6] : memref<1x3x4x8x128xf32, #tpu.memory_space<vmem>>, vector<1x1x4x8x128xf32>
    %4 = vector.shape_cast %3 : vector<1x1x4x8x128xf32> to vector<4x8x128xf32>
    %c0_7 = arith.constant 0 : index
    %c1 = arith.constant 1 : index
    %c0_8 = arith.constant 0 : index
    %c0_9 = arith.constant 0 : index
    %c0_10 = arith.constant 0 : index
    %5 = vector.load %arg3[%c0_7, %c1, %c0_8, %c0_9, %c0_10] : memref<1x3x4x8x128xf32, #tpu.memory_space<vmem>>, vector<1x1x4x8x128xf32>
    %6 = vector.shape_cast %5 : vector<1x1x4x8x128xf32> to vector<4x8x128xf32>
    %c0_11 = arith.constant 0 : index
    %c2 = arith.constant 2 : index
    %c0_12 = arith.constant 0 : index
    %c0_13 = arith.constant 0 : index
    %c0_14 = arith.constant 0 : index
    %7 = vector.load %arg3[%c0_11, %c2, %c0_12, %c0_13, %c0_14] : memref<1x3x4x8x128xf32, #tpu.memory_space<vmem>>, vector<1x1x4x8x128xf32>
    %8 = vector.shape_cast %7 : vector<1x1x4x8x128xf32> to vector<4x8x128xf32>
    %cst = arith.constant -1.600000e+01 : f32
    %9 = vector.broadcast %cst : f32 to vector<4x8x128xf32>
    %10 = arith.maximumf %8, %9 : vector<4x8x128xf32>
    %cst_15 = arith.constant 0.000000e+00 : f32
    %11 = vector.broadcast %cst_15 : f32 to vector<4x8x128xf32>
    %12 = arith.subf %11, %10 : vector<4x8x128xf32>
    %13 = math.exp %12 : vector<4x8x128xf32>
    %14 = vector.broadcast %2 : vector<1x8x128xf32> to vector<4x8x128xf32>
    %15 = arith.subf %14, %6 : vector<4x8x128xf32>
    %cst_16 = arith.constant 0.00392156886 : f32
    %16 = vector.broadcast %cst_16 : f32 to vector<4x8x128xf32>
    %17 = arith.addf %15, %16 : vector<4x8x128xf32>
    %18 = arith.mulf %13, %17 : vector<4x8x128xf32>
    %cst_17 = arith.constant 0.00392156886 : f32
    %19 = vector.broadcast %cst_17 : f32 to vector<4x8x128xf32>
    %20 = arith.subf %15, %19 : vector<4x8x128xf32>
    %21 = arith.mulf %13, %20 : vector<4x8x128xf32>
    %22 = arith.mulf %13, %15 : vector<4x8x128xf32>
    %23 = math.absf %18 : vector<4x8x128xf32>
    %cst_18 = arith.constant 0.000000e+00 : f32
    %24 = vector.broadcast %cst_18 : f32 to vector<4x8x128xf32>
    %25 = arith.subf %24, %23 : vector<4x8x128xf32>
    %26 = math.exp %25 : vector<4x8x128xf32>
    %27 = math.absf %21 : vector<4x8x128xf32>
    %cst_19 = arith.constant 0.000000e+00 : f32
    %28 = vector.broadcast %cst_19 : f32 to vector<4x8x128xf32>
    %29 = arith.subf %28, %27 : vector<4x8x128xf32>
    %30 = math.exp %29 : vector<4x8x128xf32>
    %31 = math.absf %22 : vector<4x8x128xf32>
    %cst_20 = arith.constant 0.000000e+00 : f32
    %32 = vector.broadcast %cst_20 : f32 to vector<4x8x128xf32>
    %33 = arith.subf %32, %31 : vector<4x8x128xf32>
    %34 = math.exp %33 : vector<4x8x128xf32>
    %cst_21 = arith.constant 1.000000e+00 : f32
    %35 = vector.broadcast %cst_21 : f32 to vector<4x8x128xf32>
    %36 = arith.addf %35, %26 : vector<4x8x128xf32>
    %37 = math.log %36 : vector<4x8x128xf32>
    %cst_22 = arith.constant 1.000000e+00 : f32
    %38 = vector.broadcast %cst_22 : f32 to vector<4x8x128xf32>
    %39 = arith.addf %38, %30 : vector<4x8x128xf32>
    %40 = math.log %39 : vector<4x8x128xf32>
    %cst_23 = arith.constant 1.000000e+00 : f32
    %41 = vector.broadcast %cst_23 : f32 to vector<4x8x128xf32>
    %42 = arith.addf %41, %34 : vector<4x8x128xf32>
    %43 = math.log %42 : vector<4x8x128xf32>
    %cst_24 = arith.constant 0.000000e+00 : f32
    %44 = vector.broadcast %cst_24 : f32 to vector<4x8x128xf32>
    %45 = arith.minimumf %18, %44 : vector<4x8x128xf32>
    %46 = arith.subf %45, %37 : vector<4x8x128xf32>
    %cst_25 = arith.constant 0.000000e+00 : f32
    %47 = vector.broadcast %cst_25 : f32 to vector<4x8x128xf32>
    %48 = arith.maximumf %21, %47 : vector<4x8x128xf32>
    %cst_26 = arith.constant 0.000000e+00 : f32
    %49 = vector.broadcast %cst_26 : f32 to vector<4x8x128xf32>
    %50 = arith.subf %49, %48 : vector<4x8x128xf32>
    %51 = arith.subf %50, %40 : vector<4x8x128xf32>
    %52 = arith.subf %22, %10 : vector<4x8x128xf32>
    %cst_27 = arith.constant 0.000000e+00 : f32
    %53 = vector.broadcast %cst_27 : f32 to vector<4x8x128xf32>
    %54 = arith.maximumf %22, %53 : vector<4x8x128xf32>
    %55 = arith.addf %54, %43 : vector<4x8x128xf32>
    %cst_28 = arith.constant 2.000000e+00 : f32
    %56 = vector.broadcast %cst_28 : f32 to vector<4x8x128xf32>
    %57 = arith.mulf %56, %55 : vector<4x8x128xf32>
    %58 = arith.subf %52, %57 : vector<4x8x128xf32>
    %cst_29 = arith.constant 1.000000e+00 : f32
    %59 = vector.broadcast %cst_29 : f32 to vector<4x8x128xf32>
    %60 = arith.addf %59, %26 : vector<4x8x128xf32>
    %61 = tpu.reciprocal %60 {approx = true} : vector<4x8x128xf32> -> vector<4x8x128xf32>
    %62 = arith.mulf %60, %61 : vector<4x8x128xf32>
    %cst_30 = arith.constant 2.000000e+00 : f32
    %63 = vector.broadcast %cst_30 : f32 to vector<4x8x128xf32>
    %64 = arith.subf %63, %62 : vector<4x8x128xf32>
    %65 = arith.mulf %61, %64 : vector<4x8x128xf32>
    %cst_31 = arith.constant 0.000000e+00 : f32
    %66 = vector.broadcast %cst_31 : f32 to vector<4x8x128xf32>
    %67 = arith.cmpf oge, %18, %66 : vector<4x8x128xf32>
    %68 = arith.mulf %26, %65 : vector<4x8x128xf32>
    %69 = arith.select %67, %65, %68 : vector<4x8x128xi1>, vector<4x8x128xf32>
    %cst_32 = arith.constant 1.000000e+00 : f32
    %70 = vector.broadcast %cst_32 : f32 to vector<4x8x128xf32>
    %71 = arith.addf %70, %30 : vector<4x8x128xf32>
    %72 = tpu.reciprocal %71 {approx = true} : vector<4x8x128xf32> -> vector<4x8x128xf32>
    %73 = arith.mulf %71, %72 : vector<4x8x128xf32>
    %cst_33 = arith.constant 2.000000e+00 : f32
    %74 = vector.broadcast %cst_33 : f32 to vector<4x8x128xf32>
    %75 = arith.subf %74, %73 : vector<4x8x128xf32>
    %76 = arith.mulf %72, %75 : vector<4x8x128xf32>
    %cst_34 = arith.constant 0.000000e+00 : f32
    %77 = vector.broadcast %cst_34 : f32 to vector<4x8x128xf32>
    %78 = arith.cmpf oge, %21, %77 : vector<4x8x128xf32>
    %79 = arith.mulf %30, %76 : vector<4x8x128xf32>
    %80 = arith.select %78, %76, %79 : vector<4x8x128xi1>, vector<4x8x128xf32>
    %81 = arith.subf %69, %80 : vector<4x8x128xf32>
    %cst_35 = arith.constant 9.99999974E-6 : f32
    %82 = vector.broadcast %cst_35 : f32 to vector<4x8x128xf32>
    %83 = arith.cmpf ogt, %81, %82 : vector<4x8x128xf32>
    %cst_36 = arith.constant 9.99999996E-13 : f32
    %84 = vector.broadcast %cst_36 : f32 to vector<4x8x128xf32>
    %85 = arith.maximumf %81, %84 : vector<4x8x128xf32>
    %86 = math.log %85 : vector<4x8x128xf32>
    %cst_37 = arith.constant 4.8481164 : f32
    %87 = vector.broadcast %cst_37 : f32 to vector<4x8x128xf32>
    %88 = arith.subf %58, %87 : vector<4x8x128xf32>
    %89 = arith.select %83, %86, %88 : vector<4x8x128xi1>, vector<4x8x128xf32>
    %cst_38 = arith.constant 9.990000e-01 : f32
    %90 = vector.broadcast %cst_38 : f32 to vector<1x8x128xf32>
    %91 = arith.cmpf ogt, %2, %90 : vector<1x8x128xf32>
    %92 = vector.shape_cast %91 : vector<1x8x128xi1> to vector<1x8x128xi1>
    %93 = vector.broadcast %92 : vector<1x8x128xi1> to vector<4x8x128xi1>
    %94 = arith.select %93, %51, %89 : vector<4x8x128xi1>, vector<4x8x128xf32>
    %cst_39 = arith.constant -9.990000e-01 : f32
    %95 = vector.broadcast %cst_39 : f32 to vector<1x8x128xf32>
    %96 = arith.cmpf olt, %2, %95 : vector<1x8x128xf32>
    %97 = vector.shape_cast %96 : vector<1x8x128xi1> to vector<1x8x128xi1>
    %98 = vector.broadcast %97 : vector<1x8x128xi1> to vector<4x8x128xi1>
    %99 = arith.select %98, %46, %94 : vector<4x8x128xi1>, vector<4x8x128xf32>
    %100 = arith.addf %99, %4 : vector<4x8x128xf32>
    %cst_40 = arith.constant dense<0xFF800000> : vector<8x128xf32>
    %101 = vector.multi_reduction <maximumf>, %100, %cst_40 [0] : vector<4x8x128xf32> to vector<8x128xf32>
    %102 = vector.shape_cast %101 : vector<8x128xf32> to vector<1x8x128xf32>
    %103 = vector.shape_cast %102 : vector<1x8x128xf32> to vector<8x128xf32>
    %104 = vector.broadcast %102 : vector<1x8x128xf32> to vector<4x8x128xf32>
    %105 = arith.subf %100, %104 : vector<4x8x128xf32>
    %106 = math.exp %105 : vector<4x8x128xf32>
    %cst_41 = arith.constant dense<0.000000e+00> : vector<8x128xf32>
    %107 = vector.multi_reduction <add>, %106, %cst_41 [0] : vector<4x8x128xf32> to vector<8x128xf32>
    %108 = math.log %107 : vector<8x128xf32>
    %109 = arith.addf %103, %108 : vector<8x128xf32>
    %cst_42 = arith.constant dense<0xFF800000> : vector<8x128xf32>
    %110 = vector.multi_reduction <maximumf>, %4, %cst_42 [0] : vector<4x8x128xf32> to vector<8x128xf32>
    %111 = vector.shape_cast %110 : vector<8x128xf32> to vector<1x8x128xf32>
    %112 = vector.shape_cast %111 : vector<1x8x128xf32> to vector<8x128xf32>
    %113 = vector.broadcast %111 : vector<1x8x128xf32> to vector<4x8x128xf32>
    %114 = arith.subf %4, %113 : vector<4x8x128xf32>
    %115 = math.exp %114 : vector<4x8x128xf32>
    %cst_43 = arith.constant dense<0.000000e+00> : vector<8x128xf32>
    %116 = vector.multi_reduction <add>, %115, %cst_43 [0] : vector<4x8x128xf32> to vector<8x128xf32>
    %117 = math.log %116 : vector<8x128xf32>
    %118 = arith.addf %112, %117 : vector<8x128xf32>
    %119 = arith.subf %118, %109 : vector<8x128xf32>
    %c0_44 = arith.constant 0 : index
    %c0_45 = arith.constant 0 : index
    %c0_46 = arith.constant 0 : index
    %120 = vector.load %arg4[%c0_44, %c0_45, %c0_46] : memref<1x8x128xf32, #tpu.memory_space<vmem>>, vector<1x8x128xf32>
    %121 = vector.shape_cast %120 : vector<1x8x128xf32> to vector<8x128xf32>
    %122 = vector.shape_cast %119 : vector<8x128xf32> to vector<1x8x128xf32>
    tpu.vector_store %arg4[%c0_44, %c0_45, %c0_46], %122 {strides = array<i32>} : memref<1x8x128xf32, #tpu.memory_space<vmem>>, vector<1x8x128xf32>,
    return
  }
  func.func @transform_0(%arg0: i32, %arg1: i32) -> (i32, i32, i32) {
    %c0_i32 = arith.constant 0 : i32
    %c0_i32_0 = arith.constant 0 : i32
    return %arg0, %arg1, %c0_i32 : i32, i32, i32
  }
  func.func @transform_1(%arg0: i32, %arg1: i32) -> (i32, i32, i32, i32, i32) {
    %c0_i32 = arith.constant 0 : i32
    %c0_i32_0 = arith.constant 0 : i32
    %c0_i32_1 = arith.constant 0 : i32
    %c0_i32_2 = arith.constant 0 : i32
    return %arg0, %c0_i32, %c0_i32_0, %arg1, %c0_i32_1 : i32, i32, i32, i32, i32
  }
  func.func @transform_2(%arg0: i32, %arg1: i32) -> (i32, i32, i32) {
    %c0_i32 = arith.constant 0 : i32
    %c0_i32_0 = arith.constant 0 : i32
    return %arg0, %arg1, %c0_i32 : i32, i32, i32
  }
}

</mosaic_0001>

<bundles_post_ra>
// kernel: tpu_custom_call.1
= control target key start
LH: loop header
LB: loop body
LE: loop exit
PB: predicated region body
PF: predicated region fallthrough
CT: control target
= control target key end

     0   :  { %7 = vsyncpa [#allocation3], 0  ;;  %s1516_s0 = inlined_call_operand.hbm [shape: f32[2,8,128], index: 0, kind: input, shape index: {}]   ;;  %s1517_s1 = inlined_call_operand.hbm [shape: f32[2,3,4,8,128], index: 1, kind: input, shape index: {}]   ;;  %s1518_s2 = inlined_call_operand.hbm [shape: f32[2,8,128], index: 2, kind: output, shape index: {}]  }
   0x1   :  { %9 = vsyncpa [#allocation3 + $0x1], 0 }
   0x2   :  { %10 = vsyncpa [#allocation6], 0 }
   0x3   :  { %12 = vsyncpa [#allocation6 + $0x1], 0 }
   0x4   :  { %13 = vsyncpa [#allocation4], 0 }
   0x5   :  { %15 = vsyncpa [#allocation4 + $0x1], 0  ;;  %s1034_s9 = smov 0   ;;  %s1036_s10 = smov 0  }
   0x6   :  { %s1038_s11 = smov 0   ;;  %s1040_s12 = smov 0  }
   0x7   :  { %s1042_s13 = smov 0   ;;  %s1044_s14 = smov 0  }
   0x8 LB: > { %s664_s15 = sadd.s32 4294967295, %s1012_s14   ;;  %s665_s16 = sadd.s32 4294967294, %s1012_s14   ;;  %s1012_s14 = sphi %s1044_s14, %s21_s14   ;;  %s1008_s13 = sphi %s1042_s13, %s1550_s13   ;;  %s1004_s12 = sphi %s1040_s12, %s1549_s12   ;;  %s1000_s11 = sphi %s1038_s11, %s1548_s11   ;;  %s996_s10 = sphi %s1036_s10, %s1547_s10   ;;  %s992_s9 = sphi %s1034_s9, %s1546_s9  }
   0x9   : > { %s33_s17 = sadd.s32 1, %s1008_s13  ;;  %s42_s18 = sadd.s32 1, %s1000_s11 }
   0xa   : > { %p35_p0 = scmp.ge.s32.totalorder %s33_s17, 2  ;;  %p49_p1 = scmp.ne.s32.totalorder %s1000_s11, %s996_s10 }
   0xb   : > { %p50_p2 = scmp.eq.s32.totalorder %s1012_s14, 0  ;;  %p55_p3 = scmp.ne.s32.totalorder %s996_s10, %s992_s9 }
   0xc   : > { %s1552_s17 = smov (%p35_p0, %s33_s17), 0  ;;  %p56_p5 = scmp.eq.s32.totalorder %s664_s15, 0 }
   0xd   : > { %p1075_p4 = por %p50_p2, %p49_p1  ;;  %s37_s20 = ssub.s32 %s1008_s13, %s1552_s17 }
   0xe   : > { %p109_p6 = scmp.eq.s32.totalorder %s664_s15, 1  ;;  %p40_p7 = scmp.eq.s32.totalorder %s37_s20, 0 }
   0xf   : > { %p1081_p8 = por %p56_p5, %p55_p3  ;;  %p115_p10 = scmp.eq.s32.totalorder %s665_s16, 1 }
  0x10   : > { %p1085_p9 = por %p109_p6, %p49_p1  ;;  %p714_p13 = scmp.lt.s32.totalorder %s1012_s14, 2 }
  0x11   : > { %s1526_s21 = scalar_select %p1081_p8, 1, 0 }
  0x12   : > { %s1527_s22 = scalar_select %p1085_p9, 1, 0 }
  0x13   : > { %s1090_s23 = scalar_select %p40_p7, %s1000_s11, %s42_s18  }
  0x14   : > { %p1092_p11 = por %p115_p10, %p55_p3  ;;  %s1099_s25 = sand.u32 1, %s1000_s11  }
  0x15   : > { %s668_s26 = sshll.u32 %s1099_s25, 3  ;;  %s669_s27 = sshll.u32 %s1008_s13, 7 }
  0x16   : > { %s1528_s24 = scalar_select %p1092_p11, 1, 0 }
  0x17   : > { %s1106_s30 = scalar_lea.hbm %s1516_s0, %s669_s27  ;;  %s139_s3 = scalar_lea.vmem [#allocation2], %s668_s26 }
  0x18   : > { %s147_s4 = sshll.u32 %s139_s3, 4  ;;  %p1112_p0 = pnand %p714_p13, %p1075_p4  ;;  %s1108_s4 = int_to_ptr.vmem [resolvable:$true] %s147_s4 }
  0x19   : > { %s136_s6 = scalar_lea.sflag [#allocation3], %s1099_s25  ;;  %s866_s7 = scalar_lea.hbm %s1106_s30, 128 }
  0x1a   : > { %p867_p3 = scmp.ne.s32.totalorder %s1106_s30, %s866_s7  ;;  %p868_p5 = pneg %p1112_p0 }
  0x1b   : > { %s871_s16 = scalar_lea.hbm %s1516_s0, 256  ;;  %p872_p4 = scmp.lt.u32.totalorder %s1106_s30, %s1516_s0 }
  0x1c   : > { %p869_p6 = pnand %p868_p5, %p867_p3  ;;  %p873_p10 = scmp.lt.u32.totalorder %s871_s16, %s866_s7 }
  0x1d   : > { %p875_p12 = scmp.lt.u32.totalorder %s866_s7, %s1106_s30 }
  0x1e   : > { %p870_p7 = pneg %p869_p6  ;;  %p874_p13 = por %p873_p10, %p872_p4 }
  0x20   : > { %p876_p1 = por %p875_p12, %p874_p13 }
  0x22   : > { %p877_p2 = pnand %p876_p1, %p870_p7 }
  0x24   : > { %880 = shalt.err (!%p877_p2)
}
  0x25   : > { %s881_s20 = scalar_lea.vmem %s1108_s4, 128  ;;  %s1014_s26 = smov [#allocation2]  }
  0x26   : > { %p882_p3 = scmp.ne.s32.totalorder %s1108_s4, %s881_s20  ;;  %s886_s27 = sshll.u32 %s1014_s26, 4  ;;  %s887_s27 = int_to_ptr.vmem [resolvable:$false] %s886_s27 }
  0x27   : > { %s888_s28 = scalar_lea.vmem %s887_s27, 256  ;;  %p889_p9 = scmp.lt.s32.totalorder %s1108_s4, %s887_s27 }
  0x28   : > { %p884_p6 = pnand %p882_p3, %p868_p5  ;;  %p890_p4 = scmp.lt.s32.totalorder %s888_s28, %s881_s20 }
  0x2a   : > { %p885_p11 = pneg %p884_p6  ;;  %p891_p10 = por %p890_p4, %p889_p9 }
  0x2c   : > { %p892_p12 = pnand %p891_p10, %p885_p11 }
  0x2e   : > { %895 = shalt.err (!%p892_p12)
}
  0x2f   : > { %706 = dma.hbm_to_vmem [thread:$0]  (!%p1112_p0), %s1106_s30, 128, %s1108_s4, %s136_s6  }
  0x30   : > { %p1530_p1 = scmp.lt.s32.totalorder %s1012_s14, 3  ;;  %p1531_p2 = scmp.ge.s32.totalorder %s1012_s14, 1 }
  0x31   : > { %s694_s3 = smul.u32 96, %s1099_s25  ;;  %s155_s30 = scalar_lea.sflag [#allocation6], %s1099_s25 }
  0x32   : > { %p1148_p7 = pnand %p1531_p2, %p1530_p1  ;;  %s695_s7 = smul.u32 1536, %s1008_s13 }
  0x33   : > { %s158_s18 = scalar_lea.vmem [#allocation5], %s694_s3  ;;  %s901_s26 = scalar_lea.hbm %s1517_s1, 3072 }
  0x34   : > { %s1157_s16 = scalar_lea.hbm %s1517_s1, %s695_s7  ;;  %s166_s19 = sshll.u32 %s158_s18, 4  ;;  %s1159_s19 = int_to_ptr.vmem [resolvable:$true] %s166_s19 }
  0x35   : > { %s896_s4 = scalar_lea.hbm %s1157_s16, 1536  ;;  %p902_p3 = scmp.lt.u32.totalorder %s1157_s16, %s1517_s1 }
  0x36   : > { %p897_p9 = scmp.ne.s32.totalorder %s1157_s16, %s896_s4  ;;  %p903_p6 = scmp.lt.u32.totalorder %s901_s26, %s896_s4 }
  0x37   : > { %p905_p10 = scmp.lt.u32.totalorder %s896_s4, %s1157_s16 }
  0x38   : > { %p899_p11 = pnand %p897_p9, %p868_p5  ;;  %p904_p4 = por %p903_p6, %p902_p3 }
  0x3a   : > { %p900_p13 = pneg %p899_p11  ;;  %p906_p12 = por %p905_p10, %p904_p4 }
  0x3c   : > { %p907_p1 = pnand %p906_p12, %p900_p13 }
  0x3e   : > { %910 = shalt.err (!%p907_p1)
}
  0x3f   : > { %s911_s3 = scalar_lea.vmem %s1159_s19, 1536  ;;  %s1015_s7 = smov [#allocation5]  }
  0x40   : > { %p912_p2 = scmp.ne.s32.totalorder %s1159_s19, %s911_s3  ;;  %s916_s8 = sshll.u32 %s1015_s7, 4  ;;  %s917_s8 = int_to_ptr.vmem [resolvable:$false] %s916_s8 }
  0x41   : > { %s918_s15 = scalar_lea.vmem %s917_s8, 3072  ;;  %p919_p8 = scmp.lt.s32.totalorder %s1159_s19, %s917_s8 }
  0x42   : > { %p914_p9 = pnand %p912_p2, %p868_p5  ;;  %p920_p3 = scmp.lt.s32.totalorder %s918_s15, %s911_s3 }
  0x44   : > { %p915_p11 = pneg %p914_p9  ;;  %p921_p6 = por %p920_p3, %p919_p8 }
  0x46   : > { %p922_p4 = pnand %p921_p6, %p915_p11 }
  0x48   : > { %925 = shalt.err (!%p922_p4)
}
  0x49   : > { %s1016_s18 = smov 128   ;;  %s1017_s4 = smov 8  }
  0x4a   : > { %709 = dma.hbm_to_vmem [thread:$0]  (!%p1112_p0), %s1157_s16, 1536, %s1159_s19, %s155_s30, %s1016_s18, %s1016_s18, %s1017_s4  }
  0x4b   : > { %178 = sbr.rel (%p1148_p7) target bundleno = 239 (0xef), region = 28  ;;  %s1190_s6 = sand.u32 (!%p1148_p7), 1, %s996_s10  }
  0x4c   : > { %s672_s20 = sshll.u32 (!%p1148_p7), %s1190_s6, 3  ;;  %s181_s26 = scalar_lea.sflag (!%p1148_p7), [#allocation3], %s1190_s6 }
  0x4d   : > { %s184_s27 = scalar_lea.vmem (!%p1148_p7), [#allocation2], %s672_s20  ;;  %p1533_p8 = scmp.ne.s32.totalorder (!%p1148_p7), %s1526_s21, 0 }
  0x52   : > { %979 = dma.done.wait (%p1533_p8), %s181_s26, 128  }
  0x53   : > { %981 = vsyncadd (%p1533_p8), %s181_s26, 4294967168  ;;  %s696_s25 = smul.u32 96, %s1190_s6  ;;  %s190_s5 = scalar_lea.sflag [#allocation6], %s1190_s6 }
  0x55   : > { %s1202_s29 = scalar_lea.vmem [#allocation5], %s696_s25 }
  0x56   : > { %983 = dma.done.wait (%p1533_p8), %s190_s5, 1536  }
  0x57   : > { %985 = vsyncadd (%p1533_p8), %s190_s5, 4294965760  ;;  %v1209_v0 = vld [vmem:[%s1202_s29 + $0x40] sm:$0xff]  ;;  %v1212_v1 = vld [vmem:[%s1202_s29 + $0x48] sm:$0xff]  ;;  %s691_s21 = sshll.u32 %s1004_s12, 7  ;;  %s218_s16 = scalar_lea.vmem [#allocation7], %s672_s20 }
  0x58   : > { %v1215_v2 = vld [vmem:[%s1202_s29 + $0x50] sm:$0xff]  ;;  %v1218_v3 = vld [vmem:[%s1202_s29 + $0x58] sm:$0xff]  ;;  %v1524_v4 = vmax.f32 %v1209_v0, -16.0  ;;  %v1523_v5 = vmax.f32 %v1212_v1, -16.0  ;;  %v674_v17 = vld [vmem:[%s1202_s29 + $0x20] sm:$0xff]  ;;  %s559_s19 = sshll.u32 %s218_s16, 4  ;;  %s1467_s3 = scalar_lea.hbm %s1518_s2, %s691_s21  ;;  %s1469_s19 = int_to_ptr.vmem [resolvable:$true] %s559_s19 }
  0x59   : > { %v1522_v6 = vmax.f32 %v1215_v2, -16.0  ;;  %v1521_v7 = vmax.f32 %v1218_v3, -16.0  ;;  %v1232_v16 = vld [vmem:[%s184_s27] sm:$0xff]  ;;  %v675_v18 = vld [vmem:[%s1202_s29 + $0x28] sm:$0xff]  ;;  %v1271_v57 = vld [vmem:[%s1202_s29] sm:$0xff]  ;;  %s545_s7 = scalar_lea.sflag [#allocation4], %s1190_s6 }
  0x5a   : > { %v238_v8 = vsub.f32 0.0, %v1524_v4  ;;  %v239_v9 = vsub.f32 0.0, %v1523_v5  ;;  %v676_v19 = vld [vmem:[%s1202_s29 + $0x30] sm:$0xff]  ;;  %v677_v20 = vld [vmem:[%s1202_s29 + $0x38] sm:$0xff]  ;;  %v250_v21 = vsub.f32 %v1232_v16, %v674_v17  ;;  %v251_v22 = vsub.f32 %v1232_v16, %v675_v18  ;;  %v1274_v58 = vld [vmem:[%s1202_s29 + $0x8] sm:$0xff]  ;;  %s926_s8 = scalar_lea.vmem %s1469_s19, 128 }
  0x5b   : > { %v240_v10 = vsub.f32 0.0, %v1522_v6  ;;  %v241_v11 = vsub.f32 0.0, %v1521_v7  ;;  %v252_v23 = vsub.f32 %v1232_v16, %v676_v19  ;;  %v253_v24 = vsub.f32 %v1232_v16, %v677_v20  ;;  %v1281_v62 = vld [vmem:[%s1202_s29 + $0x10] sm:$0xff]  ;;  %p927_p0 = scmp.ne.s32.totalorder %s1469_s19, %s926_s8  ;;  %p1543_p5 = scmp.ne.s32.totalorder %s1527_s22, 0 }
  0x5c   : > { %v242_v12 = vmul.f32 1.442695, %v238_v8  ;;  %v244_v13 = vmul.f32 1.442695, %v239_v9  ;;  %v254_v25 = vadd.f32 0.003921569, %v250_v21  ;;  %v521_v19 = vmax.f32 %v1271_v57, %v1274_v58 }
  0x5d   : > { %v246_v14 = vmul.f32 1.442695, %v240_v10  ;;  %v248_v15 = vmul.f32 1.442695, %v241_v11  ;;  %v255_v26 = vadd.f32 0.003921569, %v251_v22  ;;  %p928_p7 = pnand %p927_p0, %p1543_p5 }
  0x5e   : > { %766 = vpow2.f32 %v242_v12  ;;  %v256_v27 = vadd.f32 0.003921569, %v252_v23  ;;  %v257_v29 = vadd.f32 0.003921569, %v253_v24  ;;  %v682_v32 = vadd.f32 -0.003921569, %v250_v21 }
  0x5f   : > { %768 = vpow2.f32 %v244_v13  ;;  %v683_v35 = vadd.f32 -0.003921569, %v251_v22  ;;  %v684_v38 = vadd.f32 -0.003921569, %v252_v23  ;;  %v685_v40 = vadd.f32 -0.003921569, %v253_v24  ;;  %p929_p13 = pneg %p928_p7 }
  0x60   : > { %770 = vpow2.f32 %v246_v14  ;;  %v1286_v14 = vld [vmem:[%s1202_s29 + $0x18] sm:$0xff]  ;;  %vm482_vm8 = vcmp.gt.f32.partialorder %v1232_v16, 0.999  ;;  %vm489_vm9 = vcmp.lt.f32.partialorder %v1232_v16, -0.999  ;;  %s1018_s12 = smov [#allocation7]  }
  0x61   : > { %772 = vpow2.f32 %v248_v15  ;;  %s930_s15 = sshll.u32 %s1018_s12, 4  ;;  %s931_s15 = int_to_ptr.vmem [resolvable:$false] %s930_s15 }
  0x62   : > { %s932_s18 = scalar_lea.vmem %s931_s15, 256  ;;  %p933_p10 = scmp.lt.s32.totalorder %s1469_s19, %s931_s15 }
  0x63   : > { %p934_p12 = scmp.lt.s32.totalorder %s932_s18, %s926_s8 }
  0x65   : > { %p935_p1 = por %p934_p12, %p933_p10 }
  0x67   : > { %p936_p2 = pnand %p935_p1, %p929_p13 }
  0x68   : > { %v767_v28 = vpop.eup %766 }
  0x69   : > { %v769_v30 = vpop.eup %768  ;;  %v1242_v31 = vmul.f32 %v767_v28, %v254_v25  ;;  %v1251_v42 = vmul.f32 %v767_v28, %v682_v32  ;;  %v1259_v47 = vmul.f32 %v767_v28, %v250_v21 }
  0x6a   : > { %v771_v33 = vpop.eup %770  ;;  %v1244_v34 = vmul.f32 %v769_v30, %v255_v26  ;;  %v1254_v44 = vmul.f32 %v769_v30, %v683_v35  ;;  %v1264_v51 = vmul.f32 %v769_v30, %v251_v22 }
  0x6b   : > { %v773_v36 = vpop.eup %772  ;;  %v1246_v37 = vmul.f32 %v771_v33, %v256_v27  ;;  %v274_v41 = vand.u32 2147483647, %v1242_v31  ;;  %v1257_v46 = vmul.f32 %v771_v33, %v684_v38  ;;  %v290_v53 = vand.u32 2147483647, %v1251_v42 }
  0x6c   : > { %v1248_v39 = vmul.f32 %v773_v36, %v257_v29  ;;  %v275_v43 = vand.u32 2147483647, %v1244_v34  ;;  %v1261_v48 = vmul.f32 %v773_v36, %v685_v40  ;;  %v1267_v54 = vmul.f32 %v771_v33, %v252_v23 }
  0x6d   : > { %v276_v45 = vand.u32 2147483647, %v1246_v37  ;;  %v278_v50 = vsub.f32 0.0, %v274_v41  ;;  %v291_v56 = vand.u32 2147483647, %v1254_v44  ;;  %v1276_v59 = vmul.f32 %v773_v36, %v253_v24 }
  0x6e   : > { %v277_v49 = vand.u32 2147483647, %v1248_v39  ;;  %v279_v52 = vsub.f32 0.0, %v275_v43  ;;  %v292_v60 = vand.u32 2147483647, %v1257_v46  ;;  %v294_v11 = vsub.f32 0.0, %v290_v53 }
  0x6f   : > { %v280_v55 = vsub.f32 0.0, %v276_v45  ;;  %v306_v61 = vand.u32 2147483647, %v1259_v47  ;;  %v282_v8 = vmul.f32 1.442695, %v278_v50  ;;  %v295_v17 = vsub.f32 0.0, %v291_v56 }
  0x70   : > { %v281_v63 = vsub.f32 0.0, %v277_v49  ;;  %v293_v9 = vand.u32 2147483647, %v1261_v48  ;;  %v284_v10 = vmul.f32 1.442695, %v279_v52  ;;  %v296_v20 = vsub.f32 0.0, %v292_v60 }
  0x71   : > { %v307_v12 = vand.u32 2147483647, %v1264_v51  ;;  %v310_v13 = vsub.f32 0.0, %v306_v61  ;;  %v286_v15 = vmul.f32 1.442695, %v280_v55  ;;  %v522_v23 = vmax.f32 %v1281_v62, %v1286_v14 }
  0x72   : > { %v308_v18 = vand.u32 2147483647, %v1267_v54  ;;  %v309_v21 = vand.u32 2147483647, %v1276_v59  ;;  %774 = vpow2.f32 %v282_v8  ;;  %v288_v24 = vmul.f32 1.442695, %v281_v63 }
  0x73   : > { %v314_v22 = vmul.f32 1.442695, %v310_v13  ;;  %v297_v25 = vsub.f32 0.0, %v293_v9  ;;  %v298_v26 = vmul.f32 1.442695, %v294_v11  ;;  %v311_v27 = vsub.f32 0.0, %v307_v12 }
  0x74   : > { %v300_v28 = vmul.f32 1.442695, %v295_v17  ;;  %v312_v29 = vsub.f32 0.0, %v308_v18  ;;  %v302_v30 = vmul.f32 1.442695, %v296_v20  ;;  %v313_v32 = vsub.f32 0.0, %v309_v21 }
  0x75   : > { %776 = vpow2.f32 %v314_v22  ;;  %v1294_v33 = vmax.f32 %v521_v19, %v522_v23  ;;  %v304_v35 = vmul.f32 1.442695, %v297_v25  ;;  %v316_v36 = vmul.f32 1.442695, %v311_v27 }
  0x76   : > { %778 = vpow2.f32 %v284_v10  ;;  %v318_v38 = vmul.f32 1.442695, %v312_v29  ;;  %v320_v40 = vmul.f32 1.442695, %v313_v32  ;;  %vm414_vm0 = vcmp.ge.f32.partialorder %v1242_v31, 0.0 }
  0x77   : > { %780 = vpow2.f32 %v286_v15  ;;  %v524_v41 = vsub.f32 %v1271_v57, %v1294_v33  ;;  %v525_v23 = vsub.f32 %v1274_v58, %v1294_v33  ;;  %vm415_vm1 = vcmp.ge.f32.partialorder %v1244_v34, 0.0 }
  0x78   : > { %782 = vpow2.f32 %v288_v24  ;;  %v526_v24 = vsub.f32 %v1281_v62, %v1294_v33  ;;  %vm416_vm2 = vcmp.ge.f32.partialorder %v1246_v37, 0.0  ;;  %vm442_vm3 = vcmp.ge.f32.partialorder %v1251_v42, 0.0 }
  0x79   : > { %784 = vpow2.f32 %v298_v26  ;;  %v528_v49 = vmul.f32 1.442695, %v524_v41  ;;  %v1339_v32 = vmul.f32 1.442695, %v525_v23  ;;  %vm417_vm4 = vcmp.ge.f32.partialorder %v1248_v39, 0.0 }
  0x7a   : > { %786 = vpow2.f32 %v300_v28  ;;  %vm443_vm5 = vcmp.ge.f32.partialorder %v1254_v44, 0.0  ;;  %vm444_vm6 = vcmp.ge.f32.partialorder %v1257_v46, 0.0  ;;  %vm445_vm7 = vcmp.ge.f32.partialorder %v1261_v48, 0.0 }
  0x7b   : > { %788 = vpow2.f32 %v302_v30 }
  0x7c   : > { %790 = vpow2.f32 %v304_v35  ;;  %v1298_v43 = vpop.eup %774  ;;  %v1341_v35 = vmul.f32 1.442695, %v526_v24 }
  0x7d   : > { %792 = vpow2.f32 %v316_v36  ;;  %v322_v56 = vadd.f32 1.0, %v1298_v43 }
  0x7e   : > { %794 = vpow2.f32 %v318_v38 }
  0x7f   : > { %v777_v45 = vpop.eup %776  ;;  %796 = vpow2.f32 %v320_v40 }
  0x80   : > { %v1300_v50 = vpop.eup %778  ;;  %v346_v53 = vadd.f32 1.0, %v777_v45  ;;  %798 = vpow2.f32 %v528_v49 }
  0x81   : > { %v1302_v52 = vpop.eup %780  ;;  %v323_v61 = vadd.f32 1.0, %v1300_v50  ;;  %800 = vlog2.f32 %v322_v56 }
  0x82   : > { %v1304_v55 = vpop.eup %782  ;;  %v324_v8 = vadd.f32 1.0, %v1302_v52  ;;  %802 = vlog2.f32 %v346_v53 }
  0x83   : > { %v1307_v60 = vpop.eup %784  ;;  %v325_v10 = vadd.f32 1.0, %v1304_v55  ;;  %804 = vrcp.f32 %v322_v56 }
  0x84   : > { %v1310_v63 = vpop.eup %786  ;;  %v334_v12 = vadd.f32 1.0, %v1307_v60  ;;  %806 = vrcp.f32 %v323_v61 }
  0x85   : > { %v1313_v9 = vpop.eup %788  ;;  %v335_v15 = vadd.f32 1.0, %v1310_v63  ;;  %808 = vrcp.f32 %v324_v8 }
  0x86   : > { %v1316_v11 = vpop.eup %790  ;;  %v1321_v18 = vadd.f32 1.0, %v1313_v9  ;;  %810 = vrcp.f32 %v325_v10 }
  0x87   : > { %v793_v13 = vpop.eup %792  ;;  %v1324_v20 = vadd.f32 1.0, %v1316_v11  ;;  %812 = vrcp.f32 %v334_v12 }
  0x88   : > { %v795_v17 = vpop.eup %794  ;;  %v347_v21 = vadd.f32 1.0, %v793_v13  ;;  %814 = vrcp.f32 %v335_v15 }
  0x89   : > { %v797_v19 = vpop.eup %796  ;;  %v348_v22 = vadd.f32 1.0, %v795_v17  ;;  %816 = vrcp.f32 %v1321_v18 }
  0x8a   : > { %v349_v25 = vadd.f32 1.0, %v797_v19  ;;  %v1331_v26 = vpop.eup %798  ;;  %818 = vrcp.f32 %v1324_v20 }
  0x8b   : > { %v1334_v27 = vpop.eup %800  ;;  %820 = vlog2.f32 %v347_v21 }
  0x8c   : > { %v803_v29 = vpop.eup %802  ;;  %822 = vlog2.f32 %v348_v22 }
  0x8d   : > { %v805_v36 = vpop.eup %804  ;;  %824 = vlog2.f32 %v349_v25 }
  0x8e   : > { %v807_v45 = vpop.eup %806  ;;  %826 = vlog2.f32 %v323_v61  ;;  %v402_v49 = vmul.f32 %v805_v36, %v322_v56 }
  0x8f   : > { %v809_v53 = vpop.eup %808  ;;  %828 = vlog2.f32 %v324_v8  ;;  %v403_v13 = vmul.f32 %v807_v45, %v323_v61 }
  0x90   : > { %v811_v17 = vpop.eup %810  ;;  %830 = vlog2.f32 %v325_v10  ;;  %v404_v19 = vmul.f32 %v809_v53, %v324_v8  ;;  %v406_v21 = vsub.f32 2.0, %v402_v49 }
  0x91   : > { %v813_v56 = vpop.eup %812  ;;  %832 = vlog2.f32 %v334_v12  ;;  %v405_v22 = vmul.f32 %v811_v17, %v325_v10  ;;  %v407_v23 = vsub.f32 2.0, %v403_v13 }
  0x92   : > { %v815_v24 = vpop.eup %814  ;;  %834 = vlog2.f32 %v335_v15  ;;  %v408_v61 = vsub.f32 2.0, %v404_v19  ;;  %v410_v25 = vmul.f32 %v805_v36, %v406_v21  ;;  %v430_v28 = vmul.f32 %v813_v56, %v334_v12 }
  0x93   : > { %v817_v7 = vpop.eup %816  ;;  %836 = vlog2.f32 %v1321_v18  ;;  %v409_v8 = vsub.f32 2.0, %v405_v22  ;;  %v411_v49 = vmul.f32 %v807_v45, %v407_v23  ;;  %v431_v6 = vmul.f32 %v815_v24, %v335_v15 }
  0x94   : > { %v819_v5 = vpop.eup %818  ;;  %v412_v4 = vmul.f32 %v809_v53, %v408_v61  ;;  %v418_v10 = vmul.f32 %v1298_v43, %v410_v25  ;;  %v432_v13 = vmul.f32 %v817_v7, %v1321_v18  ;;  %v434_v41 = vsub.f32 2.0, %v430_v28 }
  0x95   : > { %v821_v40 = vpop.eup %820  ;;  %v413_v38 = vmul.f32 %v811_v17, %v409_v8  ;;  %v419_v36 = vmul.f32 %v1300_v50, %v411_v49  ;;  %v433_v12 = vmul.f32 %v819_v5, %v1324_v20  ;;  %v435_v19 = vsub.f32 2.0, %v431_v6 }
  0x96   : > { %v823_v21 = vpop.eup %822  ;;  %838 = vlog2.f32 %v1324_v20  ;;  %v420_v45 = vmul.f32 %v1302_v52, %v412_v4  ;;  %v436_v15 = vsub.f32 2.0, %v432_v13  ;;  %v438_v22 = vmul.f32 %v813_v56, %v434_v41 }
  0x97   : > { %v825_v53 = vpop.eup %824  ;;  %v351_v23 = vmul.f32 0.6931472, %v803_v29  ;;  %v421_v43 = vmul.f32 %v1304_v55, %v413_v38  ;;  %v437_v18 = vsub.f32 2.0, %v433_v12  ;;  %v439_v28 = vmul.f32 %v815_v24, %v435_v19 }
  0x98   : > { %v827_v61 = vpop.eup %826  ;;  %v353_v17 = vmul.f32 0.6931472, %v821_v40  ;;  %v422_v50 = vsel %vm414_vm0, %v410_v25, %v418_v10  ;;  %v440_v8 = vmul.f32 %v817_v7, %v436_v15  ;;  %v446_v6 = vmul.f32 %v1307_v60, %v438_v22 }
  0x99   : > { %v829_v30 = vpop.eup %828  ;;  %v355_v20 = vmul.f32 0.6931472, %v823_v21  ;;  %v423_v52 = vsel %vm415_vm1, %v411_v49, %v419_v36  ;;  %v441_v41 = vmul.f32 %v819_v5, %v437_v18  ;;  %v447_v29 = vmul.f32 %v1310_v63, %v439_v28 }
  0x9a   : > { %v1368_v56 = vpop.eup %830  ;;  %v357_v55 = vmul.f32 0.6931472, %v825_v53  ;;  %v424_v40 = vsel %vm416_vm2, %v412_v4, %v420_v45  ;;  %v448_v24 = vmul.f32 %v1313_v9, %v440_v8  ;;  %v450_v7 = vsel %vm442_vm3, %v438_v22, %v446_v6 }
  0x9b   : > { %v833_v60 = vpop.eup %832  ;;  %v425_v25 = vsel %vm417_vm4, %v413_v38, %v421_v43  ;;  %v449_v49 = vmul.f32 %v1316_v11, %v441_v41  ;;  %v451_v5 = vsel %vm443_vm5, %v439_v28, %v447_v29  ;;  %v1380_v63 = vsub.f32 %v422_v50, %v450_v7 }
  0x9c   : > { %v835_v10 = vpop.eup %834  ;;  %v358_v13 = vmin.f32 %v1242_v31, 0.0  ;;  %v1534_v4 = vmax.f32 %v1259_v47, 0.0  ;;  %v452_v36 = vsel %vm444_vm6, %v440_v8, %v448_v24  ;;  %v1387_v12 = vsub.f32 %v423_v52, %v451_v5 }
  0x9d   : > { %v837_v19 = vpop.eup %836  ;;  %v1535_v38 = vmax.f32 %v1264_v51, 0.0  ;;  %v453_v21 = vsel %vm445_vm7, %v441_v41, %v449_v49  ;;  %v1393_v45 = vsub.f32 %v424_v40, %v452_v36  ;;  %v462_v15 = vmax.f32 %v1380_v63, 1e-12 }
  0x9e   : > { %v386_v9 = vadd.f32 %v1534_v4, %v351_v23  ;;  %v359_v31 = vmin.f32 %v1244_v34, 0.0  ;;  %v1536_v22 = vmax.f32 %v1267_v54, 0.0  ;;  %v1399_v23 = vsub.f32 %v425_v25, %v453_v21 }
  0x9f   : > { %v387_v11 = vadd.f32 %v1535_v38, %v353_v17  ;;  %v463_v43 = vmax.f32 %v1387_v12, 1e-12  ;;  %v366_v18 = vmax.f32 %v1251_v42, 0.0  ;;  %v1537_v28 = vmax.f32 %v1276_v59, 0.0 }
  0xa0   : > { %v388_v53 = vadd.f32 %v1536_v22, %v355_v20  ;;  %v464_v50 = vmax.f32 %v1393_v45, 1e-12  ;;  %840 = vlog2.f32 %v462_v15  ;;  %v839_v8 = vpop.eup %838  ;;  %v1538_v6 = vmax.f32 %v1209_v0, -16.0 }
  0xa1   : > { %v389_v17 = vadd.f32 %v1537_v28, %v357_v55  ;;  %v390_v52 = vmul.f32 2.0, %v386_v9  ;;  %v465_v20 = vmax.f32 %v1399_v23, 1e-12  ;;  %842 = vlog2.f32 %v463_v43 }
  0xa2   : > { %v378_v34 = vsub.f32 %v1259_v47, %v1538_v6  ;;  %v367_v41 = vmax.f32 %v1254_v44, 0.0  ;;  %v1539_v29 = vmax.f32 %v1212_v1, -16.0  ;;  %v391_v40 = vmul.f32 2.0, %v387_v11 }
  0xa3   : > { %844 = vlog2.f32 %v464_v50  ;;  %v368_v55 = vmax.f32 %v1257_v46, 0.0  ;;  %v1540_v24 = vmax.f32 %v1215_v2, -16.0  ;;  %v392_v7 = vmul.f32 2.0, %v388_v53 }
  0xa4   : > { %v379_v42 = vsub.f32 %v1264_v51, %v1539_v29  ;;  %846 = vlog2.f32 %v465_v20  ;;  %v327_v47 = vmul.f32 0.6931472, %v1334_v27  ;;  %v369_v44 = vmax.f32 %v1261_v48, 0.0 }
  0xa5   : > { %v380_v0 = vsub.f32 %v1267_v54, %v1540_v24  ;;  %v1541_v1 = vmax.f32 %v1218_v3, -16.0  ;;  %v393_v25 = vmul.f32 2.0, %v389_v17  ;;  %v329_v46 = vmul.f32 0.6931472, %v827_v61 }
  0xa6   : > { %v360_v2 = vmin.f32 %v1246_v37, 0.0  ;;  %v361_v54 = vmin.f32 %v1248_v39, 0.0  ;;  %v394_v49 = vsub.f32 %v378_v34, %v390_v52  ;;  %v331_v5 = vmul.f32 0.6931472, %v829_v30 }
  0xa7   : > { %v381_v51 = vsub.f32 %v1276_v59, %v1541_v1  ;;  %v339_v4 = vmul.f32 0.6931472, %v833_v60  ;;  %v370_v9 = vsub.f32 0.0, %v366_v18  ;;  %v395_v36 = vsub.f32 %v379_v42, %v391_v40 }
  0xa8   : > { %v341_v27 = vmul.f32 0.6931472, %v835_v10  ;;  %v371_v38 = vsub.f32 0.0, %v367_v41  ;;  %v372_v48 = vsub.f32 0.0, %v368_v55  ;;  %v396_v11 = vsub.f32 %v380_v0, %v392_v7 }
  0xa9   : > { %v343_v3 = vmul.f32 0.6931472, %v837_v19  ;;  %v362_v21 = vsub.f32 %v358_v13, %v327_v47  ;;  %v373_v59 = vsub.f32 0.0, %v369_v44  ;;  %v397_v15 = vsub.f32 %v381_v51, %v393_v25 }
  0xaa   : > { %v333_v22 = vmul.f32 0.6931472, %v1368_v56  ;;  %v345_v61 = vmul.f32 0.6931472, %v839_v8  ;;  %v363_v53 = vsub.f32 %v359_v31, %v329_v46  ;;  %v686_v37 = vadd.f32 -4.8481164, %v394_v49  ;;  %v841_v43 = vpop.eup %840 }
  0xab   : > { %v364_v39 = vsub.f32 %v360_v2, %v331_v5  ;;  %v374_v28 = vsub.f32 %v370_v9, %v339_v4  ;;  %vm458_vm10 = vcmp.gt.f32.partialorder %v1380_v63, 1e-05  ;;  %v687_v30 = vadd.f32 -4.8481164, %v395_v36  ;;  %v843_v60 = vpop.eup %842 }
  0xac   : > { %v375_v10 = vsub.f32 %v371_v38, %v341_v27  ;;  %vm459_vm11 = vcmp.gt.f32.partialorder %v1387_v12, 1e-05  ;;  %v467_v18 = vmul.f32 0.6931472, %v841_v43  ;;  %v688_v19 = vadd.f32 -4.8481164, %v396_v11 }
  0xad   : > { %v845_v13 = vpop.eup %844  ;;  %v376_v17 = vsub.f32 %v372_v48, %v343_v3  ;;  %vm460_vm12 = vcmp.gt.f32.partialorder %v1393_v45, 1e-05  ;;  %v469_v56 = vmul.f32 0.6931472, %v843_v60  ;;  %v689_v50 = vadd.f32 -4.8481164, %v397_v15 }
  0xae   : > { %v847_v31 = vpop.eup %846  ;;  %v377_v8 = vsub.f32 %v373_v59, %v345_v61  ;;  %vm461_vm13 = vcmp.gt.f32.partialorder %v1399_v23, 1e-05  ;;  %v471_v6 = vmul.f32 0.6931472, %v845_v13  ;;  %v478_v34 = vsel %vm458_vm10, %v467_v18, %v686_v37 }
  0xaf   : > { %v365_v52 = vsub.f32 %v361_v54, %v333_v22  ;;  %v473_v20 = vmul.f32 0.6931472, %v847_v31  ;;  %v479_v41 = vsel %vm459_vm11, %v469_v56, %v687_v30  ;;  %v485_v12 = vsel %vm482_vm8, %v374_v28, %v478_v34 }
  0xb0   : > { %v480_v29 = vsel %vm460_vm12, %v471_v6, %v688_v19  ;;  %v486_v45 = vsel %vm482_vm8, %v375_v10, %v479_v41  ;;  %v492_v42 = vsel %vm489_vm9, %v362_v21, %v485_v12  ;;  %848 = vpow2.f32 %v1339_v32 }
  0xb1   : > { %v481_v23 = vsel %vm461_vm13, %v473_v20, %v689_v50  ;;  %v487_v63 = vsel %vm482_vm8, %v376_v17, %v480_v29  ;;  %v493_v40 = vsel %vm489_vm9, %v363_v53, %v486_v45  ;;  %v496_v55 = vadd.f32 %v492_v42, %v1271_v57 }
  0xb2   : > { %v488_v24 = vsel %vm482_vm8, %v377_v8, %v481_v23  ;;  %v494_v0 = vsel %vm489_vm9, %v364_v39, %v487_v63  ;;  %v497_v7 = vadd.f32 %v493_v40, %v1274_v58  ;;  %850 = vpow2.f32 %v1341_v35 }
  0xb3   : > { %v495_v32 = vsel %vm489_vm9, %v365_v52, %v488_v24  ;;  %v498_v47 = vadd.f32 %v494_v0, %v1281_v62  ;;  %v1542_v57 = vsub.f32 %v1286_v14, %v1294_v33 }
  0xb4   : > { %v499_v44 = vadd.f32 %v495_v32, %v1286_v14  ;;  %v500_v1 = vmax.f32 %v496_v55, %v497_v7 }
  0xb5   : > { %v534_v51 = vmul.f32 1.442695, %v1542_v57 }
  0xb6   : > { %v501_v25 = vmax.f32 %v498_v47, %v499_v44 }
  0xb7   : > { %852 = vpow2.f32 %v534_v51 }
  0xb8   : > { %v502_v46 = vmax.f32 %v500_v1, %v501_v25 }
  0xba   : > { %v849_v2 = vpop.eup %848  ;;  %v503_v54 = vsub.f32 %v496_v55, %v502_v46  ;;  %v504_v58 = vsub.f32 %v497_v7, %v502_v46  ;;  %v505_v49 = vsub.f32 %v498_v47, %v502_v46  ;;  %v506_v16 = vsub.f32 %v499_v44, %v502_v46 }
  0xbb   : > { %v536_v36 = vadd.f32 %v849_v2, %v1331_v26 }
  0xbc   : > { %v507_v5 = vmul.f32 1.442695, %v503_v54  ;;  %v509_v4 = vmul.f32 1.442695, %v504_v58  ;;  %v511_v62 = vmul.f32 1.442695, %v505_v49  ;;  %v851_v35 = vpop.eup %850 }
  0xbd   : > { %v513_v9 = vmul.f32 1.442695, %v506_v16  ;;  %v537_v14 = vadd.f32 %v851_v35, %v536_v36 }
  0xbe   : > { %854 = vpow2.f32 %v507_v5 }
  0xbf   : > { %856 = vpow2.f32 %v509_v4 }
  0xc0   : > { %858 = vpow2.f32 %v511_v62 }
  0xc1   : > { %860 = vpow2.f32 %v513_v9  ;;  %v853_v27 = vpop.eup %852 }
  0xc2   : > { %v538_v38 = vadd.f32 %v853_v27, %v537_v14 }
  0xc4   : > { %862 = vlog2.f32 %v538_v38 }
  0xc8   : > { %v855_v48 = vpop.eup %854 }
  0xc9   : > { %v857_v11 = vpop.eup %856 }
  0xca   : > { %v859_v3 = vpop.eup %858  ;;  %v515_v21 = vadd.f32 %v857_v11, %v855_v48 }
  0xcb   : > { %v861_v59 = vpop.eup %860 }
  0xcc   : > { %v516_v15 = vadd.f32 %v859_v3, %v515_v21 }
  0xce   : > { %v517_v22 = vadd.f32 %v861_v59, %v516_v15  ;;  %v863_v26 = vpop.eup %862 }
  0xcf   : > { %v540_v61 = vmul.f32 0.6931472, %v863_v26 }
  0xd0   : > { %864 = vlog2.f32 %v517_v22 }
  0xd1   : > { %v541_v43 = vadd.f32 %v540_v61, %v1294_v33 }
  0xda   : > { %v865_v53 = vpop.eup %864 }
  0xdb   : > { %v519_v37 = vmul.f32 0.6931472, %v865_v53 }
  0xdd   : > { %v520_v39 = vadd.f32 %v519_v37, %v502_v46 }
  0xdf   : > { %v542_v28 = vsub.f32 %v541_v43, %v520_v39 }
  0xe1   : > { %543 = vst [vmem:[%s218_s16] sm:$0xff] %v542_v28 }
  0xe2   : > { %939 = shalt.err (!%p936_p2)
}
  0xe3   : > { %s940_s4 = scalar_lea.hbm %s1467_s3, 128  ;;  %s944_s26 = scalar_lea.hbm %s1518_s2, 256 }
  0xe4   : > { %p941_p9 = scmp.ne.s32.totalorder %s1467_s3, %s940_s4  ;;  %p945_p6 = scmp.lt.u32.totalorder %s1467_s3, %s1518_s2 }
  0xe5   : > { %p946_p4 = scmp.lt.u32.totalorder %s944_s26, %s940_s4  ;;  %p948_p0 = scmp.lt.u32.totalorder %s940_s4, %s1467_s3 }
  0xe6   : > { %p942_p11 = pnand %p941_p9, %p1543_p5 }
  0xe7   : > { %p947_p8 = por %p946_p4, %p945_p6 }
  0xe8   : > { %p943_p3 = pneg %p942_p11 }
  0xe9   : > { %p949_p7 = por %p948_p0, %p947_p8 }
  0xeb   : > { %p950_p13 = pnand %p949_p7, %p943_p3 }
  0xed   : > { %953 = shalt.err (!%p950_p13)
}
  0xee   : > { %701 = dma.vmem_to_hbm [thread:$0]  (%p1543_p5), %s1469_s19, 128, %s1467_s3, %s545_s7  }
  0xef PF: > { %s571_s5 = sand.u32 1, %s992_s9   ;;  %p1544_p10 = scmp.ne.s32.totalorder %s1528_s24, 0 }
  0xf0   : > { %p1545_p12 = scmp.ge.s32.totalorder %s1012_s14, 2  ;;  %s572_s29 = scalar_lea.sflag [#allocation4], %s571_s5 }
  0xf2   : > { %p711_p1 = pnand %p1545_p12, %p1544_p10 }
  0xf4   : > { %987 = dma.done.wait (!%p711_p1), %s572_s29, 128  }
  0xf5   : > { %989 = vsyncadd (!%p711_p1), %s572_s29, 4294967168  ;;  %s21_s14 = sadd.s32 1, %s1012_s14   ;;  %s1546_s9 = smov %s996_s10 }
  0xf6   : > { %p18_p2 = scmp.ge.s32.totalorder %s21_s14, 4   ;;  %s1547_s10 = smov %s1000_s11 }
  0xf7   : > { %s1548_s11 = smov %s1090_s23  ;;  %s1549_s12 = smov %s1008_s13 }
  0xf8   : > { %s1550_s13 = smov %s1552_s17  ;;  %20 = sbr.rel (!%p18_p2) target bundleno = 8 (0x8), region = 88 }
  0xff   :  { %577 = vsyncpa [#allocation3], 1 }
 0x100   :  { %579 = vsyncpa [#allocation3 + $0x1], 1 }
 0x101   :  { %580 = vsyncpa [#allocation6], 1 }
 0x102   :  { %582 = vsyncpa [#allocation6 + $0x1], 1 }
 0x103   :  { %583 = vsyncpa [#allocation4], 1 }
 0x104   :  { %585 = vsyncpa [#allocation4 + $0x1], 1 }

</bundles_post_ra>
